<compile_context>
chip_gen: v7x
topology: tpu7x:2x2x1
jax: 0.10.0
libtpu: 0.0.40
codegen_flags: <defaults>
</compile_context>

<pallas_src>
import numpy as np

import jax
import jax.numpy as jnp
from jax.experimental import pallas as pl
from jax.experimental.pallas import tpu as pltpu


def _gaussian_1d(window_size: int, sigma: float) -> np.ndarray:
    x = np.arange(window_size, dtype=np.float64)
    g = np.exp(-((x - window_size // 2) ** 2) / (2.0 * sigma ** 2))
    return (g / g.sum()).astype(np.float32)


def _banded_filter_matrix(n: int, window_size: int) -> np.ndarray:
    """T[j, c] = w[j - c + pad] (zero outside the band).

    For a length-n row vector x, `x @ T` equals the 1-D Gaussian
    cross-correlation of x with zero padding of window_size//2 on both sides,
    i.e. exactly one axis of F.conv2d(..., padding=window_size//2).
    """
    g = _gaussian_1d(window_size, 1.5)
    pad = window_size // 2
    j = np.arange(n)[:, None]
    c = np.arange(n)[None, :]
    k = j - c + pad
    mask = (k >= 0) & (k < window_size)
    T = np.zeros((n, n), dtype=np.float32)
    T[mask] = g[k[mask]]
    return T


def _ssim_kernel(i1_ref, i2_ref, thb_ref, tv_ref, out_ref):
    """One grid step = B planes folded along the lane axis.

    i1_ref, i2_ref: (1, H, L) with L = B*W; plane b occupies lanes [b*W,(b+1)*W).
    thb_ref:        (L, L) block-diagonal banded Gaussian (horizontal pass).
    tv_ref:         (H, H) banded Gaussian (vertical pass, left-multiply).
    out_ref:        (1, 1, L) per-plane column sums of the SSIM map.
    """
    p1 = i1_ref[0]       # (H, L)
    p2 = i2_ref[0]
    thb = thb_ref[...]   # (L, L)
    tv = tv_ref[...]     # (H, H)
    C1 = 0.01 ** 2
    C2 = 0.03 ** 2

    def gfilt(x):
        # Separable Gaussian filter as two MXU matmuls; the zero padding of
        # F.conv2d(padding=win//2) is absorbed into the banded matrices and the
        # block-diagonal structure keeps planes independent.
        t = jnp.dot(x, thb, preferred_element_type=jnp.float32)      # (H, L)
        return jnp.dot(tv, t, preferred_element_type=jnp.float32)    # (H, L)

    mu1 = gfilt(p1)
    mu2 = gfilt(p2)
    mu1_sq = mu1 * mu1
    mu2_sq = mu2 * mu2
    mu1_mu2 = mu1 * mu2

    sigma1_sq = gfilt(p1 * p1) - mu1_sq
    sigma2_sq = gfilt(p2 * p2) - mu2_sq
    sigma12 = gfilt(p1 * p2) - mu1_mu2

    num = (2.0 * mu1_mu2 + C1) * (2.0 * sigma12 + C2)
    den = (mu1_sq + mu2_sq + C1) * (sigma1_sq + sigma2_sq + C2)
    # NOTE: exact division kept (not pl.reciprocal(approx=True)) to preserve
    # the 1e-4/1e-5 tolerance; after the MXU reformulation the VPU is not the
    # binding slot so this costs little.
    ssim_map = num / den

    # Sublane (column) sums -> one lane-dense (1, L) store per step; the final
    # tiny cross-lane reduction and division happen in the wrapper in f32.
    out_ref[0] = jnp.sum(ssim_map, axis=0, keepdims=True)


def ssim_pallas(img1, img2, window_size: int = 11, size_average: bool = True):
    if img1.ndim == 3:
        img1 = img1[None]
    if img2.ndim == 3:
        img2 = img2[None]
    N, C, H, W = img1.shape
    NC = N * C

    i1 = img1.astype(jnp.float32).reshape(NC, H, W)
    i2 = img2.astype(jnp.float32).reshape(NC, H, W)

    # Planes folded along the lane axis per grid step: aim for a few hundred
    # dense lanes, never more planes than exist, and keep the (double-buffered)
    # image blocks + the block-diagonal filter comfortably inside VMEM on every
    # generation (v7x only has 64 MiB physical VMEM).
    target_lanes = 256
    B = max(1, min(NC, -(-target_lanes // W)))

    def _block_bytes(b):
        L = b * W
        return 4 * (2 * 2 * H * L + L * L + H * H + 2 * L)

    while B > 1 and _block_bytes(B) > 16 * 1024 * 1024:
        B -= 1
    # TODO(synk): planes too large to be VMEM-resident (huge H*W) would need a
    # tiled / shift-and-add filter instead of whole-plane banded matmuls.

    num_blocks = -(-NC // B)  # cdiv
    NC_pad = num_blocks * B
    if NC_pad != NC:
        # Zero planes give SSIM==1 everywhere but are sliced away below.
        z = jnp.zeros((NC_pad - NC, H, W), jnp.float32)
        i1 = jnp.concatenate([i1, z], axis=0)
        i2 = jnp.concatenate([i2, z], axis=0)

    L = B * W
    # (NC_pad, H, W) -> (num_blocks, H, B*W): B planes side by side along lanes.
    i1 = i1.reshape(num_blocks, B, H, W).transpose(0, 2, 1, 3).reshape(num_blocks, H, L)
    i2 = i2.reshape(num_blocks, B, H, W).transpose(0, 2, 1, 3).reshape(num_blocks, H, L)

    Th = _banded_filter_matrix(W, window_size)                       # (W, W)
    ThB = jnp.asarray(np.kron(np.eye(B, dtype=np.float32), Th))      # (L, L)
    Tv = jnp.asarray(_banded_filter_matrix(H, window_size).T)        # (H, H)

    partial_sums = pl.pallas_call(
        _ssim_kernel,
        out_shape=jax.ShapeDtypeStruct((num_blocks, 1, L), jnp.float32),
        grid=(num_blocks,),
        in_specs=[
            pl.BlockSpec((1, H, L), lambda i: (i, 0, 0)),
            pl.BlockSpec((1, H, L), lambda i: (i, 0, 0)),
            pl.BlockSpec((L, L), lambda i: (0, 0)),
            pl.BlockSpec((H, H), lambda i: (0, 0)),
        ],
        out_specs=pl.BlockSpec((1, 1, L), lambda i: (i, 0, 0)),
        compiler_params=pltpu.CompilerParams(
            dimension_semantics=("parallel",),
            vmem_limit_bytes=32 * 1024 * 1024,
        ),
    )(i1, i2, ThB, Tv)

    # (num_blocks, 1, B*W) -> per-plane sums; padded planes sliced away.
    per_plane = jnp.sum(partial_sums.reshape(NC_pad, W)[:NC], axis=-1)  # (NC,)
    if size_average:
        return jnp.sum(per_plane) / (NC * H * W)
    # size_average=False: ssim_map.mean(1).mean(1).mean(1) == per-sample mean
    # over (C, H, W).
    return jnp.sum(per_plane.reshape(N, C), axis=1) / (C * H * W)


def _ssim_reference(img1, img2, window_size: int = 11):
    """Pure-JAX reference (depthwise conv via lax) for correctness check."""
    N, C, H, W = img1.shape
    pad = window_size // 2
    g = _gaussian_1d(window_size, 1.5)
    win2d = np.outer(g, g).astype(np.float32)
    kern = jnp.asarray(np.broadcast_to(win2d, (C, 1, window_size, window_size)).copy())

    def dwconv(x):
        return jax.lax.conv_general_dilated(
            x, kern, window_strides=(1, 1), padding=[(pad, pad), (pad, pad)],
            dimension_numbers=("NCHW", "OIHW", "NCHW"), feature_group_count=C)

    mu1, mu2 = dwconv(img1), dwconv(img2)
    mu1_sq, mu2_sq, mu1_mu2 = mu1 * mu1, mu2 * mu2, mu1 * mu2
    s1 = dwconv(img1 * img1) - mu1_sq
    s2 = dwconv(img2 * img2) - mu2_sq
    s12 = dwconv(img1 * img2) - mu1_mu2
    C1, C2 = 0.01 ** 2, 0.03 ** 2
    m = ((2 * mu1_mu2 + C1) * (2 * s12 + C2)) / ((mu1_sq + mu2_sq + C1) * (s1 + s2 + C2))
    return jnp.mean(m)


if __name__ == "__main__":
    key = jax.random.PRNGKey(0)
    k1, k2 = jax.random.split(key)
    N, C, H, W = 2, 4, 16, 16
    img1 = jax.random.uniform(k1, (N, C, H, W), dtype=jnp.float32)
    img2 = jax.random.uniform(k2, (N, C, H, W), dtype=jnp.float32)

    out = ssim_pallas(img1, img2)
    out = jax.block_until_ready(out)

    ref = jax.block_until_ready(_ssim_reference(img1, img2))
    np.testing.assert_allclose(np.asarray(out), np.asarray(ref), rtol=1e-4, atol=1e-5)

    print("KERNEL_OK")
</pallas_src>

<mosaic_0001>
module attributes {stable_mosaic.version = 11 : i64} {
  func.func @_ssim_kernel(%arg0: i32, %arg1: memref<1x16x128xf32, #tpu.memory_space<vmem>>, %arg2: memref<1x16x128xf32, #tpu.memory_space<vmem>>, %arg3: memref<128x128xf32, #tpu.memory_space<vmem>>, %arg4: memref<16x16xf32, #tpu.memory_space<vmem>>, %arg5: memref<1x1x128xf32, #tpu.memory_space<vmem>>) attributes {dimension_semantics = [#tpu.dimension_semantics<parallel>], iteration_bounds = array<i64: 1>, scalar_prefetch = 0 : i64, scratch_operands = 0 : i64, tpu.core_type = #tpu.core_type<tc>, window_params = [{transform_indices = @transform_0, window_bounds = array<i64: 1, 16, 128>}, {transform_indices = @transform_1, window_bounds = array<i64: 1, 16, 128>}, {pipeline_mode = #tpu.pipeline_mode<synchronous>, transform_indices = @transform_2, window_bounds = array<i64: 128, 128>}, {pipeline_mode = #tpu.pipeline_mode<synchronous>, transform_indices = @transform_3, window_bounds = array<i64: 16, 16>}, {transform_indices = @transform_4, window_bounds = array<i64: 1, 1, 128>}]} {
    %c0 = arith.constant 0 : index
    %c0_0 = arith.constant 0 : index
    %c0_1 = arith.constant 0 : index
    %0 = vector.load %arg1[%c0, %c0_0, %c0_1] : memref<1x16x128xf32, #tpu.memory_space<vmem>>, vector<1x16x128xf32>
    %1 = vector.shape_cast %0 : vector<1x16x128xf32> to vector<16x128xf32>
    %c0_2 = arith.constant 0 : index
    %c0_3 = arith.constant 0 : index
    %c0_4 = arith.constant 0 : index
    %2 = vector.load %arg2[%c0_2, %c0_3, %c0_4] : memref<1x16x128xf32, #tpu.memory_space<vmem>>, vector<1x16x128xf32>
    %3 = vector.shape_cast %2 : vector<1x16x128xf32> to vector<16x128xf32>
    %c0_5 = arith.constant 0 : index
    %c0_6 = arith.constant 0 : index
    %4 = vector.load %arg3[%c0_5, %c0_6] : memref<128x128xf32, #tpu.memory_space<vmem>>, vector<128x128xf32>
    %c0_7 = arith.constant 0 : index
    %c0_8 = arith.constant 0 : index
    %5 = vector.load %arg4[%c0_7, %c0_8] : memref<16x16xf32, #tpu.memory_space<vmem>>, vector<16x16xf32>
    %cst = arith.constant dense<0.000000e+00> : vector<16x128xf32>
    %6 = tpu.matmul %1, %4, %cst {dimension_numbers = #tpu.dot_dimension_numbers<[1], [0], [0], [1], [0, 0, 1, 1], [], []>} : vector<16x128xf32>, vector<128x128xf32>, vector<16x128xf32> -> vector<16x128xf32>
    %cst_9 = arith.constant dense<0.000000e+00> : vector<16x128xf32>
    %7 = tpu.matmul %5, %6, %cst_9 {dimension_numbers = #tpu.dot_dimension_numbers<[1], [0], [0], [1], [0, 0, 1, 1], [], []>} : vector<16x16xf32>, vector<16x128xf32>, vector<16x128xf32> -> vector<16x128xf32>
    %cst_10 = arith.constant dense<0.000000e+00> : vector<16x128xf32>
    %8 = tpu.matmul %3, %4, %cst_10 {dimension_numbers = #tpu.dot_dimension_numbers<[1], [0], [0], [1], [0, 0, 1, 1], [], []>} : vector<16x128xf32>, vector<128x128xf32>, vector<16x128xf32> -> vector<16x128xf32>
    %cst_11 = arith.constant dense<0.000000e+00> : vector<16x128xf32>
    %9 = tpu.matmul %5, %8, %cst_11 {dimension_numbers = #tpu.dot_dimension_numbers<[1], [0], [0], [1], [0, 0, 1, 1], [], []>} : vector<16x16xf32>, vector<16x128xf32>, vector<16x128xf32> -> vector<16x128xf32>
    %10 = arith.mulf %7, %7 : vector<16x128xf32>
    %11 = arith.mulf %9, %9 : vector<16x128xf32>
    %12 = arith.mulf %7, %9 : vector<16x128xf32>
    %13 = arith.mulf %1, %1 : vector<16x128xf32>
    %cst_12 = arith.constant dense<0.000000e+00> : vector<16x128xf32>
    %14 = tpu.matmul %13, %4, %cst_12 {dimension_numbers = #tpu.dot_dimension_numbers<[1], [0], [0], [1], [0, 0, 1, 1], [], []>} : vector<16x128xf32>, vector<128x128xf32>, vector<16x128xf32> -> vector<16x128xf32>
    %cst_13 = arith.constant dense<0.000000e+00> : vector<16x128xf32>
    %15 = tpu.matmul %5, %14, %cst_13 {dimension_numbers = #tpu.dot_dimension_numbers<[1], [0], [0], [1], [0, 0, 1, 1], [], []>} : vector<16x16xf32>, vector<16x128xf32>, vector<16x128xf32> -> vector<16x128xf32>
    %16 = arith.subf %15, %10 : vector<16x128xf32>
    %17 = arith.mulf %3, %3 : vector<16x128xf32>
    %cst_14 = arith.constant dense<0.000000e+00> : vector<16x128xf32>
    %18 = tpu.matmul %17, %4, %cst_14 {dimension_numbers = #tpu.dot_dimension_numbers<[1], [0], [0], [1], [0, 0, 1, 1], [], []>} : vector<16x128xf32>, vector<128x128xf32>, vector<16x128xf32> -> vector<16x128xf32>
    %cst_15 = arith.constant dense<0.000000e+00> : vector<16x128xf32>
    %19 = tpu.matmul %5, %18, %cst_15 {dimension_numbers = #tpu.dot_dimension_numbers<[1], [0], [0], [1], [0, 0, 1, 1], [], []>} : vector<16x16xf32>, vector<16x128xf32>, vector<16x128xf32> -> vector<16x128xf32>
    %20 = arith.subf %19, %11 : vector<16x128xf32>
    %21 = arith.mulf %1, %3 : vector<16x128xf32>
    %cst_16 = arith.constant dense<0.000000e+00> : vector<16x128xf32>
    %22 = tpu.matmul %21, %4, %cst_16 {dimension_numbers = #tpu.dot_dimension_numbers<[1], [0], [0], [1], [0, 0, 1, 1], [], []>} : vector<16x128xf32>, vector<128x128xf32>, vector<16x128xf32> -> vector<16x128xf32>
    %cst_17 = arith.constant dense<0.000000e+00> : vector<16x128xf32>
    %23 = tpu.matmul %5, %22, %cst_17 {dimension_numbers = #tpu.dot_dimension_numbers<[1], [0], [0], [1], [0, 0, 1, 1], [], []>} : vector<16x16xf32>, vector<16x128xf32>, vector<16x128xf32> -> vector<16x128xf32>
    %24 = arith.subf %23, %12 : vector<16x128xf32>
    %cst_18 = arith.constant 2.000000e+00 : f32
    %25 = vector.broadcast %cst_18 : f32 to vector<16x128xf32>
    %26 = arith.mulf %25, %12 : vector<16x128xf32>
    %cst_19 = arith.constant 9.99999974E-5 : f32
    %27 = vector.broadcast %cst_19 : f32 to vector<16x128xf32>
    %28 = arith.addf %26, %27 : vector<16x128xf32>
    %cst_20 = arith.constant 2.000000e+00 : f32
    %29 = vector.broadcast %cst_20 : f32 to vector<16x128xf32>
    %30 = arith.mulf %29, %24 : vector<16x128xf32>
    %cst_21 = arith.constant 8.99999984E-4 : f32
    %31 = vector.broadcast %cst_21 : f32 to vector<16x128xf32>
    %32 = arith.addf %30, %31 : vector<16x128xf32>
    %33 = arith.mulf %28, %32 : vector<16x128xf32>
    %34 = arith.addf %10, %11 : vector<16x128xf32>
    %cst_22 = arith.constant 9.99999974E-5 : f32
    %35 = vector.broadcast %cst_22 : f32 to vector<16x128xf32>
    %36 = arith.addf %34, %35 : vector<16x128xf32>
    %37 = arith.addf %16, %20 : vector<16x128xf32>
    %cst_23 = arith.constant 8.99999984E-4 : f32
    %38 = vector.broadcast %cst_23 : f32 to vector<16x128xf32>
    %39 = arith.addf %37, %38 : vector<16x128xf32>
    %40 = arith.mulf %36, %39 : vector<16x128xf32>
    %41 = arith.divf %33, %40 : vector<16x128xf32>
    %cst_24 = arith.constant dense<0.000000e+00> : vector<128xf32>
    %42 = vector.multi_reduction <add>, %41, %cst_24 [0] : vector<16x128xf32> to vector<128xf32>
    %43 = vector.shape_cast %42 : vector<128xf32> to vector<1x128xf32>
    %c0_25 = arith.constant 0 : index
    %c0_26 = arith.constant 0 : index
    %c0_27 = arith.constant 0 : index
    %44 = vector.load %arg5[%c0_25, %c0_26, %c0_27] : memref<1x1x128xf32, #tpu.memory_space<vmem>>, vector<1x1x128xf32>
    %45 = vector.shape_cast %44 : vector<1x1x128xf32> to vector<1x128xf32>
    %46 = vector.shape_cast %43 : vector<1x128xf32> to vector<1x1x128xf32>
    tpu.vector_store %arg5[%c0_25, %c0_26, %c0_27], %46 {strides = array<i32>} : memref<1x1x128xf32, #tpu.memory_space<vmem>>, vector<1x1x128xf32>,
    return
  }
  func.func @transform_0(%arg0: i32) -> (i32, i32, i32) {
    %c0_i32 = arith.constant 0 : i32
    %c0_i32_0 = arith.constant 0 : i32
    %c0_i32_1 = arith.constant 0 : i32
    return %arg0, %c0_i32, %c0_i32_0 : i32, i32, i32
  }
  func.func @transform_1(%arg0: i32) -> (i32, i32, i32) {
    %c0_i32 = arith.constant 0 : i32
    %c0_i32_0 = arith.constant 0 : i32
    %c0_i32_1 = arith.constant 0 : i32
    return %arg0, %c0_i32, %c0_i32_0 : i32, i32, i32
  }
  func.func @transform_2(%arg0: i32) -> (i32, i32) {
    %c0_i32 = arith.constant 0 : i32
    %c0_i32_0 = arith.constant 0 : i32
    %c0_i32_1 = arith.constant 0 : i32
    return %c0_i32, %c0_i32_0 : i32, i32
  }
  func.func @transform_3(%arg0: i32) -> (i32, i32) {
    %c0_i32 = arith.constant 0 : i32
    %c0_i32_0 = arith.constant 0 : i32
    %c0_i32_1 = arith.constant 0 : i32
    return %c0_i32, %c0_i32_0 : i32, i32
  }
  func.func @transform_4(%arg0: i32) -> (i32, i32, i32) {
    %c0_i32 = arith.constant 0 : i32
    %c0_i32_0 = arith.constant 0 : i32
    %c0_i32_1 = arith.constant 0 : i32
    return %arg0, %c0_i32, %c0_i32_0 : i32, i32, i32
  }
}

</mosaic_0001>

<bundles_post_ra>
// kernel: tpu_custom_call.1
= control target key start
LH: loop header
LB: loop body
LE: loop exit
PB: predicated region body
PF: predicated region fallthrough
CT: control target
= control target key end

     0   :  { %9 = vsyncpa [#allocation3], 0  ;;  %s1808_s0 = inlined_call_operand.hbm [shape: f32[1,16,128], index: 0, kind: input, shape index: {}]   ;;  %s1809_s1 = inlined_call_operand.hbm [shape: f32[1,16,128], index: 1, kind: input, shape index: {}]   ;;  %s1810_s2 = inlined_call_operand.hbm [shape: f32[128,128], index: 2, kind: input, shape index: {}]   ;;  %s1811_s3 = inlined_call_operand.hbm [shape: f32[16,16], index: 3, kind: input, shape index: {}]   ;;  %s1812_s4 = inlined_call_operand.hbm [shape: f32[1,1,128], index: 4, kind: output, shape index: {}]  }
   0x1   :  { %10 = vsyncpa [#allocation6], 0 }
   0x2   :  { %11 = vsyncpa [#allocation9], 0 }
   0x3   :  { %12 = vsyncpa [#allocation4], 0  ;;  %s1558_s15 = smov [#allocation5]   ;;  %s1559_s17 = smov [#allocation2]  }
   0x4   :  { %s30_s16 = sshll.u32 %s1558_s15, 4  ;;  %s18_s18 = sshll.u32 %s1559_s17, 4  ;;  %s31_s16 = int_to_ptr.vmem [resolvable:$true] %s30_s16  ;;  %s1590_s18 = int_to_ptr.vmem [resolvable:$true] %s18_s18 }
   0x5   :  { %s1440_s21 = scalar_lea.hbm %s1809_s1, 256 }
   0x6   :  { %p1441_p0 = scmp.ne.s32.totalorder %s1809_s1, %s1440_s21  ;;  %p1444_p1 = scmp.lt.u32.totalorder %s1440_s21, %s1809_s1 }
   0x8   :  { %p1446_p2 = pnand %p1444_p1, %p1441_p0 }
   0xa   :  { %1449 = shalt.err (!%p1446_p2)
}
   0xb   :  { %s1450_s26 = scalar_lea.vmem %s31_s16, 256  ;;  %p1455_p4 = scmp.lt.s32.totalorder %s31_s16, %s31_s16 }
   0xc   :  { %p1451_p3 = scmp.ne.s32.totalorder %s31_s16, %s1450_s26  ;;  %p1456_p5 = scmp.lt.s32.totalorder %s1450_s26, %s1450_s26 }
   0xe   :  { %p1457_p6 = por %p1456_p5, %p1455_p4 }
  0x10   :  { %p1458_p7 = pnand %p1457_p6, %p1451_p3 }
  0x12   :  { %1461 = shalt.err (!%p1458_p7)
}
  0x13   :  { %s1560_s27 = smov 128   ;;  %s1561_s28 = smov 8  }
  0x14   :  { %36 = dma.hbm_to_vmem [thread:$0]  %s1809_s1, 256, %s31_s16, [#allocation6], %s1560_s27, %s1560_s27, %s1561_s28  }
  0x15   :  { %s1462_s7 = scalar_lea.hbm %s1808_s0, 256 }
  0x16   :  { %p1463_p8 = scmp.ne.s32.totalorder %s1808_s0, %s1462_s7  ;;  %p1466_p9 = scmp.lt.u32.totalorder %s1462_s7, %s1808_s0 }
  0x18   :  { %p1468_p10 = pnand %p1466_p9, %p1463_p8 }
  0x1a   :  { %1471 = shalt.err (!%p1468_p10)
}
  0x1b   :  { %s1472_s12 = scalar_lea.vmem %s1590_s18, 256  ;;  %p1477_p12 = scmp.lt.s32.totalorder %s1590_s18, %s1590_s18 }
  0x1c   :  { %p1473_p11 = scmp.ne.s32.totalorder %s1590_s18, %s1472_s12  ;;  %p1478_p13 = scmp.lt.s32.totalorder %s1472_s12, %s1472_s12 }
  0x1e   :  { %p1479_p0 = por %p1478_p13, %p1477_p12 }
  0x20   :  { %p1480_p1 = pnand %p1479_p0, %p1473_p11 }
  0x22   :  { %1483 = shalt.err (!%p1480_p1)
}
  0x23   :  { %24 = dma.hbm_to_vmem [thread:$0]  %s1808_s0, 256, %s1590_s18, [#allocation3], %s1560_s27, %s1560_s27, %s1561_s28  }
  0x24   :  { %s1562_s14 = smov [#allocation7]   ;;  %s1563_s16 = smov [#allocation8]  }
  0x25   :  { %s42_s15 = sshll.u32 %s1562_s14, 4  ;;  %s54_s17 = sshll.u32 %s1563_s16, 4  ;;  %s43_s15 = int_to_ptr.vmem [resolvable:$true] %s42_s15  ;;  %s1627_s17 = int_to_ptr.vmem [resolvable:$true] %s54_s17 }
  0x26   :  { %s1484_s21 = scalar_lea.hbm %s1810_s2, 2048 }
  0x27   :  { %p1485_p2 = scmp.ne.s32.totalorder %s1810_s2, %s1484_s21  ;;  %p1488_p3 = scmp.lt.u32.totalorder %s1484_s21, %s1810_s2 }
  0x29   :  { %p1490_p4 = pnand %p1488_p3, %p1485_p2 }
  0x2b   :  { %1493 = shalt.err (!%p1490_p4)
}
  0x2c   :  { %s1494_s0 = scalar_lea.vmem %s43_s15, 2048  ;;  %p1499_p6 = scmp.lt.s32.totalorder %s43_s15, %s43_s15 }
  0x2d   :  { %p1495_p5 = scmp.ne.s32.totalorder %s43_s15, %s1494_s0  ;;  %p1500_p7 = scmp.lt.s32.totalorder %s1494_s0, %s1494_s0 }
  0x2f   :  { %p1501_p8 = por %p1500_p7, %p1499_p6 }
  0x31   :  { %p1502_p9 = pnand %p1501_p8, %p1495_p5 }
  0x33   :  { %1505 = shalt.err (!%p1502_p9)
}
  0x34   :  { %48 = dma.hbm_to_vmem [thread:$0]  %s1810_s2, 2048, %s43_s15, [#allocation6], %s1560_s27, %s1560_s27, %s1561_s28  }
  0x35   :  { %s1506_s5 = scalar_lea.hbm %s1811_s3, 256 }
  0x36   :  { %p1507_p10 = scmp.ne.s32.totalorder %s1811_s3, %s1506_s5  ;;  %p1510_p11 = scmp.lt.u32.totalorder %s1506_s5, %s1811_s3 }
  0x38   :  { %p1512_p12 = pnand %p1510_p11, %p1507_p10 }
  0x3a   :  { %1515 = shalt.err (!%p1512_p12)
}
  0x3b   :  { %s1516_s10 = scalar_lea.vmem %s1627_s17, 256  ;;  %p1521_p0 = scmp.lt.s32.totalorder %s1627_s17, %s1627_s17 }
  0x3c   :  { %p1517_p13 = scmp.ne.s32.totalorder %s1627_s17, %s1516_s10  ;;  %p1522_p1 = scmp.lt.s32.totalorder %s1516_s10, %s1516_s10 }
  0x3e   :  { %p1523_p2 = por %p1522_p1, %p1521_p0 }
  0x40   :  { %p1524_p3 = pnand %p1523_p2, %p1517_p13 }
  0x42   :  { %1527 = shalt.err (!%p1524_p3)
}
  0x43   :  { %60 = dma.hbm_to_vmem [thread:$0]  %s1811_s3, 256, %s1627_s17, [#allocation9], %s1560_s27, %s1560_s27, %s1561_s28  }
  0x44   :  { %1550 = dma.done.wait [#allocation3], 256  }
  0x45   :  { %1551 = vsyncadd [#allocation3], 4294967040 }
  0x46   :  { %1552 = dma.done.wait [#allocation6], 2304  }
  0x47   :  { %1553 = vsyncadd [#allocation6], 4294964992 }
  0x48   :  { %1554 = dma.done.wait [#allocation9], 256  }
  0x49   :  { %1555 = vsyncadd [#allocation9], 4294967040  ;;  %v77_v0 = vld [vmem:[#allocation7] sm:$0xff]  ;;  %v78_v1 = vld [vmem:[#allocation7 + $0x8] sm:$0xff]  ;;  %vm170_vm0 = vcmask 130048   ;;  %s1564_s3 = smov [#allocation10]  }
  0x4a   :  { %v79_v2 = vld [vmem:[#allocation7 + $0x10] sm:$0xff]  ;;  %v1664_v3 = vpack.c.bf16 %v78_v1, %v77_v0  ;;  %v80_v4 = vld [vmem:[#allocation7 + $0x18] sm:$0xff]  ;;  %v81_v6 = vld [vmem:[#allocation7 + $0x20] sm:$0xff]  ;;  %s908_s27 = sshll.u32 %s1564_s3, 4  ;;  %s909_s27 = int_to_ptr.vmem [resolvable:$true] %s908_s27 }
  0x4b   :  { %v1666_v5 = vpack.c.bf16 %v80_v4, %v79_v2  ;;  %v82_v7 = vld [vmem:[#allocation7 + $0x28] sm:$0xff]  ;;  %v1673_v9 = vld [vmem:[#allocation2] sm:$0xff]  ;;  %v83_v10 = vld [vmem:[#allocation7 + $0x30] sm:$0xff]  ;;  %s1528_s28 = scalar_lea.vmem %s909_s27, 16  ;;  %s1532_s12 = scalar_lea.vmem %s909_s27, 32 }
  0x4c   :  { %1250 = vmatprep.subr.bf16.mxu0 %v1664_v3  ;;  %v1671_v8 = vpack.c.bf16 %v82_v7, %v81_v6  ;;  %v84_v11 = vld [vmem:[#allocation7 + $0x38] sm:$0xff]  ;;  %1071 = vmatprep.mubr.f32.mxu0 %v1673_v9  ;;  %v85_v13 = vld [vmem:[#allocation7 + $0x40] sm:$0xff]  ;;  %v86_v14 = vld [vmem:[#allocation7 + $0x48] sm:$0xff]  ;;  %v408_v28 = vmul.f32 %v1673_v9, %v1673_v9  ;;  %p1529_p4 = scmp.ne.s32.totalorder %s909_s27, %s1528_s28  ;;  %p1533_p5 = scmp.lt.s32.totalorder %s909_s27, %s909_s27 }
  0x4d   :  { %1252 = vmatpush3.bf16.msra.mxu0 %v1664_v3  ;;  %v1678_v12 = vpack.c.bf16 %v84_v11, %v83_v10  ;;  %v1682_v15 = vpack.c.bf16 %v86_v14, %v85_v13  ;;  %v87_v16 = vld [vmem:[#allocation7 + $0x50] sm:$0xff]  ;;  %v88_v17 = vld [vmem:[#allocation7 + $0x58] sm:$0xff]  ;;  %v89_v19 = vld [vmem:[#allocation7 + $0x60] sm:$0xff]  ;;  %p1534_p6 = scmp.lt.s32.totalorder %s1532_s12, %s1528_s28 }
  0x4e   :  { %1254 = vmatprep.subr.bf16.mxu0 %v1666_v5  ;;  %v1686_v18 = vpack.c.bf16 %v88_v17, %v87_v16  ;;  %v90_v20 = vld [vmem:[#allocation7 + $0x68] sm:$0xff]  ;;  %v91_v22 = vld [vmem:[#allocation7 + $0x70] sm:$0xff]  ;;  %v92_v23 = vld [vmem:[#allocation7 + $0x78] sm:$0xff] }
  0x4f   :  { %v1690_v21 = vpack.c.bf16 %v90_v20, %v89_v19  ;;  %v1694_v24 = vpack.c.bf16 %v92_v23, %v91_v22  ;;  %v1699_v25 = vld [vmem:[#allocation2 + $0x8] sm:$0xff]  ;;  %v1719_v26 = vld [vmem:[#allocation8] sm:$0xff]  ;;  %v75_v33 = vld [vmem:[#allocation5] sm:$0xff]  ;;  %p1535_p7 = por %p1534_p6, %p1533_p5 }
  0x50   :  { %1078 = vmatprep.mubr.msk.f32.mxu1 %vm170_vm0, %v1719_v26  ;;  %v409_v27 = vmul.f32 %v1699_v25, %v1699_v25  ;;  %v1742_v32 = vld [vmem:[#allocation8 + $0x8] sm:$0xff]  ;;  %v76_v34 = vld [vmem:[#allocation5 + $0x8] sm:$0xff]  ;;  %v716_v39 = vmul.f32 %v75_v33, %v1673_v9  ;;  %v562_v45 = vmul.f32 %v75_v33, %v75_v33 }
  0x51   :  { %1256 = vmatpush3.bf16.msra.mxu0 %v1666_v5  ;;  %v717_v38 = vmul.f32 %v76_v34, %v1699_v25  ;;  %v563_v46 = vmul.f32 %v76_v34, %v76_v34  ;;  %p1536_p8 = pnand %p1535_p7, %p1529_p4 }
  0x52   :  { %1258 = vmatprep.subr.bf16.mxu0 %v1671_v8 }
  0x55   :  { %1260 = vmatpush3.bf16.msra.mxu0 %v1671_v8 }
  0x56   :  { %1262 = vmatprep.subr.bf16.mxu0 %v1678_v12 }
  0x59   :  { %1264 = vmatpush3.bf16.msra.mxu0 %v1678_v12 }
  0x5a   :  { %1266 = vmatprep.subr.bf16.mxu0 %v1682_v15 }
  0x5d   :  { %1268 = vmatpush3.bf16.msra.mxu0 %v1682_v15 }
  0x5e   :  { %1270 = vmatprep.subr.bf16.mxu0 %v1686_v18 }
  0x61   :  { %1272 = vmatpush3.bf16.msra.mxu0 %v1686_v18 }
  0x62   :  { %1274 = vmatprep.subr.bf16.mxu0 %v1690_v21 }
  0x65   :  { %1276 = vmatpush3.bf16.msra.mxu0 %v1690_v21 }
  0x66   :  { %1278 = vmatprep.subr.bf16.mxu0 %v1694_v24 }
  0x69   :  { %1280 = vmatpush3.bf16.msra.mxu0 %v1694_v24 }
  0x6a   :  { %1322 = vmatprep.subr.bf16.mxu0 %v1664_v3 }
  0x6c   :  { %1072 = vmatmul.mubr.f32.vlgmr.msra.gmra.mrb[0].mxu0 %v1699_v25 }
  0x6d   :  { %1324 = vmatpush3.bf16.msra.mxu0 %v1664_v3  ;;  %1155 = vmatprep.mubr.f32.mxu0 %v408_v28 }
  0x6e   :  { %1326 = vmatprep.subr.bf16.mxu0 %v1666_v5 }
  0x71   :  { %1328 = vmatpush3.bf16.msra.mxu0 %v1666_v5 }
  0x72   :  { %1330 = vmatprep.subr.bf16.mxu0 %v1671_v8 }
  0x75   :  { %1332 = vmatpush3.bf16.msra.mxu0 %v1671_v8 }
  0x76   :  { %1334 = vmatprep.subr.bf16.mxu0 %v1678_v12 }
  0x79   :  { %1336 = vmatpush3.bf16.msra.mxu0 %v1678_v12 }
  0x7a   :  { %1338 = vmatprep.subr.bf16.mxu0 %v1682_v15 }
  0x7d   :  { %1340 = vmatpush3.bf16.msra.mxu0 %v1682_v15 }
  0x7e   :  { %1342 = vmatprep.subr.bf16.mxu0 %v1686_v18 }
  0x81   :  { %1344 = vmatpush3.bf16.msra.mxu0 %v1686_v18 }
  0x82   :  { %1346 = vmatprep.subr.bf16.mxu0 %v1690_v21 }
  0x85   :  { %1348 = vmatpush3.bf16.msra.mxu0 %v1690_v21 }
  0x86   :  { %1350 = vmatprep.subr.bf16.mxu0 %v1694_v24 }
  0x89   :  { %1352 = vmatpush3.bf16.msra.mxu0 %v1694_v24 }
  0x8a   :  { %1394 = vmatprep.subr.bf16.mxu0 %v1664_v3 }
  0x8c   :  { %1156 = vmatmul.mubr.f32.vlgmr.msra.gmra.mrb[2].mxu0 %v409_v27 }
  0x8d   :  { %1396 = vmatpush3.bf16.msra.mxu0 %v1664_v3  ;;  %1239 = vmatprep.mubr.f32.mxu0 %v716_v39 }
  0x8e   :  { %1398 = vmatprep.subr.bf16.mxu0 %v1666_v5 }
  0x91   :  { %1400 = vmatpush3.bf16.msra.mxu0 %v1666_v5 }
  0x92   :  { %1402 = vmatprep.subr.bf16.mxu0 %v1671_v8 }
  0x95   :  { %1404 = vmatpush3.bf16.msra.mxu0 %v1671_v8 }
  0x96   :  { %1406 = vmatprep.subr.bf16.mxu0 %v1678_v12 }
  0x99   :  { %1408 = vmatpush3.bf16.msra.mxu0 %v1678_v12 }
  0x9a   :  { %1410 = vmatprep.subr.bf16.mxu0 %v1682_v15 }
  0x9d   :  { %1412 = vmatpush3.bf16.msra.mxu0 %v1682_v15 }
  0x9e   :  { %1414 = vmatprep.subr.bf16.mxu0 %v1686_v18 }
  0xa1   :  { %1416 = vmatpush3.bf16.msra.mxu0 %v1686_v18 }
  0xa2   :  { %1418 = vmatprep.subr.bf16.mxu0 %v1690_v21 }
  0xa5   :  { %1420 = vmatpush3.bf16.msra.mxu0 %v1690_v21 }
  0xa6   :  { %1422 = vmatprep.subr.bf16.mxu0 %v1694_v24 }
  0xa9   :  { %1424 = vmatpush3.bf16.msra.mxu0 %v1694_v24 }
  0xac   :  { %1240 = vmatmul.mubr.f32.vlgmr.msra.gmra.mrb[4].mxu0 %v717_v38 }
 0x13f   :  { %v1073_v29 = vpop.f32.mrb[0].mxu0 }
 0x140   :  { %v161_v30 = vpop.f32.mrb[1].mxu0 }
 0x141   :  { %v1281_v31 = vpack.c.bf16 %v1073_v29, %v161_v30 }
 0x143   :  { %1282 = vmatprep.subr.bf16.mxu1 %v1281_v31 }
 0x144   :  { %1284 = vmatpush3.bf16.msra.mxu1 %v1281_v31 }
 0x145   :  { %1286 = vmatprep.subr.bf16.mxu1 %v1664_v3 }
 0x147   :  { %1079 = vmatmul.mubr.msk.f32.vlgmr.msra.gmra.mrb[0].mxu1 %vm170_vm0, %v1742_v32 }
 0x148   :  { %1288 = vmatpush3.bf16.msra.mxu1 %v1664_v3  ;;  %1113 = vmatprep.mubr.f32.mxu1 %v75_v33 }
 0x149   :  { %1290 = vmatprep.subr.bf16.mxu1 %v1666_v5 }
 0x14c   :  { %1292 = vmatpush3.bf16.msra.mxu1 %v1666_v5 }
 0x14d   :  { %1294 = vmatprep.subr.bf16.mxu1 %v1671_v8 }
 0x150   :  { %1296 = vmatpush3.bf16.msra.mxu1 %v1671_v8 }
 0x151   :  { %1298 = vmatprep.subr.bf16.mxu1 %v1678_v12 }
 0x154   :  { %1300 = vmatpush3.bf16.msra.mxu1 %v1678_v12 }
 0x155   :  { %1302 = vmatprep.subr.bf16.mxu1 %v1682_v15 }
 0x158   :  { %1304 = vmatpush3.bf16.msra.mxu1 %v1682_v15 }
 0x159   :  { %1306 = vmatprep.subr.bf16.mxu1 %v1686_v18 }
 0x15c   :  { %1308 = vmatpush3.bf16.msra.mxu1 %v1686_v18 }
 0x15d   :  { %1310 = vmatprep.subr.bf16.mxu1 %v1690_v21 }
 0x15f   :  { %v1157_v35 = vpop.f32.mrb[2].mxu0 }
 0x160   :  { %1312 = vmatpush3.bf16.msra.mxu1 %v1690_v21  ;;  %v476_v36 = vpop.f32.mrb[3].mxu0 }
 0x161   :  { %1314 = vmatprep.subr.bf16.mxu1 %v1694_v24  ;;  %v1353_v37 = vpack.c.bf16 %v1157_v35, %v476_v36 }
 0x164   :  { %1316 = vmatpush3.bf16.msra.mxu1 %v1694_v24 }
 0x167   :  { %1114 = vmatmul.mubr.f32.vlgmr.msra.gmra.mrb[2].mxu1 %v76_v34 }
 0x168   :  { %1120 = vmatprep.mubr.msk.f32.mxu1 %vm170_vm0, %v1719_v26 }
 0x17f   :  { %v1241_v47 = vpop.f32.mrb[4].mxu0 }
 0x180   :  { %v784_v48 = vpop.f32.mrb[5].mxu0 }
 0x181   :  { %v1425_v49 = vpack.c.bf16 %v1241_v47, %v784_v48 }
 0x21a   :  { %v1080_v40 = vpop.f32.mrb[0].mxu1 }
 0x21b   :  { %v243_v41 = vpop.f32.mrb[1].mxu1  ;;  %v403_v51 = vmul.f32 %v1080_v40, %v1080_v40 }
 0x21c   :  { %v402_v55 = vmul.f32 %v243_v41, %v243_v41 }
 0x23a   :  { %v1115_v42 = vpop.f32.mrb[2].mxu1 }
 0x23b   :  { %v318_v43 = vpop.f32.mrb[3].mxu1 }
 0x23c   :  { %v1317_v44 = vpack.c.bf16 %v1115_v42, %v318_v43 }
 0x23e   :  { %1318 = vmatprep.subr.bf16.mxu1 %v1317_v44 }
 0x23f   :  { %1320 = vmatpush3.bf16.msra.mxu1 %v1317_v44 }
 0x240   :  { %1354 = vmatprep.subr.bf16.mxu1 %v1353_v37 }
 0x242   :  { %1121 = vmatmul.mubr.msk.f32.vlgmr.msra.gmra.mrb[4].mxu1 %vm170_vm0, %v1742_v32 }
 0x243   :  { %1356 = vmatpush3.bf16.msra.mxu1 %v1353_v37  ;;  %1162 = vmatprep.mubr.msk.f32.mxu1 %vm170_vm0, %v1719_v26 }
 0x244   :  { %1358 = vmatprep.subr.bf16.mxu1 %v1664_v3 }
 0x246   :  { %1163 = vmatmul.mubr.msk.f32.vlgmr.msra.gmra.mrb[6].mxu1 %vm170_vm0, %v1742_v32 }
 0x247   :  { %1360 = vmatpush3.bf16.msra.mxu1 %v1664_v3  ;;  %1197 = vmatprep.mubr.f32.mxu1 %v562_v45 }
 0x248   :  { %1362 = vmatprep.subr.bf16.mxu1 %v1666_v5 }
 0x24b   :  { %1364 = vmatpush3.bf16.msra.mxu1 %v1666_v5 }
 0x24c   :  { %1366 = vmatprep.subr.bf16.mxu1 %v1671_v8 }
 0x24f   :  { %1368 = vmatpush3.bf16.msra.mxu1 %v1671_v8 }
 0x250   :  { %1370 = vmatprep.subr.bf16.mxu1 %v1678_v12 }
 0x253   :  { %1372 = vmatpush3.bf16.msra.mxu1 %v1678_v12 }
 0x254   :  { %1374 = vmatprep.subr.bf16.mxu1 %v1682_v15 }
 0x257   :  { %1376 = vmatpush3.bf16.msra.mxu1 %v1682_v15 }
 0x258   :  { %1378 = vmatprep.subr.bf16.mxu1 %v1686_v18 }
 0x25b   :  { %1380 = vmatpush3.bf16.msra.mxu1 %v1686_v18 }
 0x25c   :  { %1382 = vmatprep.subr.bf16.mxu1 %v1690_v21 }
 0x25f   :  { %1384 = vmatpush3.bf16.msra.mxu1 %v1690_v21 }
 0x260   :  { %1386 = vmatprep.subr.bf16.mxu1 %v1694_v24 }
 0x263   :  { %1388 = vmatpush3.bf16.msra.mxu1 %v1694_v24 }
 0x266   :  { %1198 = vmatmul.mubr.f32.vlgmr.msra.gmra.mrb[8].mxu1 %v563_v46 }
 0x267   :  { %1204 = vmatprep.mubr.msk.f32.mxu1 %vm170_vm0, %v1719_v26 }
 0x315   :  { %v1122_v50 = vpop.f32.mrb[4].mxu1 }
 0x316   :  { %v405_v52 = vmul.f32 %v1122_v50, %v1122_v50  ;;  %v407_v53 = vmul.f32 %v1122_v50, %v1080_v40  ;;  %v393_v54 = vpop.f32.mrb[5].mxu1 }
 0x317   :  { %v404_v56 = vmul.f32 %v393_v54, %v393_v54  ;;  %v406_v57 = vmul.f32 %v393_v54, %v243_v41 }
 0x318   :  { %v881_v58 = vadd.f32 %v405_v52, %v403_v51  ;;  %v871_v10 = vmul.f32 2.0, %v407_v53 }
 0x319   :  { %v880_v59 = vadd.f32 %v404_v56, %v402_v55  ;;  %v1164_v60 = vpop.f32.mrb[6].mxu1  ;;  %v870_v15 = vmul.f32 2.0, %v406_v57 }
 0x31a   :  { %v561_v61 = vsub.f32 %v1164_v60, %v403_v51  ;;  %v551_v62 = vpop.f32.mrb[7].mxu1  ;;  %v883_v11 = vadd.f32 0.0001, %v881_v58  ;;  %v873_v23 = vadd.f32 0.0001, %v871_v10 }
 0x31b   :  { %v560_v63 = vsub.f32 %v551_v62, %v402_v55  ;;  %v882_v16 = vadd.f32 0.0001, %v880_v59  ;;  %v872_v25 = vadd.f32 0.0001, %v870_v15 }
 0x339   :  { %v1199_v0 = vpop.f32.mrb[8].mxu1 }
 0x33a   :  { %v630_v1 = vpop.f32.mrb[9].mxu1 }
 0x33b   :  { %v1389_v2 = vpack.c.bf16 %v1199_v0, %v630_v1 }
 0x33d   :  { %1390 = vmatprep.subr.bf16.mxu1 %v1389_v2 }
 0x33e   :  { %1392 = vmatpush3.bf16.msra.mxu1 %v1389_v2 }
 0x33f   :  { %1426 = vmatprep.subr.bf16.mxu1 %v1425_v49 }
 0x341   :  { %1205 = vmatmul.mubr.msk.f32.vlgmr.msra.gmra.mrb[10].mxu1 %vm170_vm0, %v1742_v32 }
 0x342   :  { %1428 = vmatpush3.bf16.msra.mxu1 %v1425_v49  ;;  %1246 = vmatprep.mubr.msk.f32.mxu1 %vm170_vm0, %v1719_v26 }
 0x345   :  { %1247 = vmatmul.mubr.msk.f32.vlgmr.msra.gmra.mrb[12].mxu1 %vm170_vm0, %v1742_v32 }
 0x414   :  { %v1206_v3 = vpop.f32.mrb[10].mxu1 }
 0x415   :  { %v715_v4 = vsub.f32 %v1206_v3, %v405_v52  ;;  %v705_v5 = vpop.f32.mrb[11].mxu1 }
 0x416   :  { %v714_v6 = vsub.f32 %v705_v5, %v404_v56 }
 0x417   :  { %v885_v7 = vadd.f32 %v715_v4, %v561_v61 }
 0x418   :  { %v884_v8 = vadd.f32 %v714_v6, %v560_v63  ;;  %v1248_v9 = vpop.f32.mrb[12].mxu1 }
 0x419   :  { %v887_v12 = vadd.f32 0.0009, %v885_v7  ;;  %v869_v13 = vsub.f32 %v1248_v9, %v407_v53  ;;  %v859_v14 = vpop.f32.mrb[13].mxu1 }
 0x41a   :  { %v886_v17 = vadd.f32 0.0009, %v884_v8  ;;  %v868_v18 = vsub.f32 %v859_v14, %v406_v57 }
 0x41b   :  { %v889_v19 = vmul.f32 %v887_v12, %v883_v11  ;;  %v875_v20 = vmul.f32 2.0, %v869_v13 }
 0x41c   :  { %v888_v21 = vmul.f32 %v886_v17, %v882_v16  ;;  %v874_v22 = vmul.f32 2.0, %v868_v18 }
 0x41d   :  { %1436 = vrcp.f32 %v889_v19  ;;  %v877_v24 = vadd.f32 0.0009, %v875_v20 }
 0x41e   :  { %1438 = vrcp.f32 %v888_v21  ;;  %v876_v26 = vadd.f32 0.0009, %v874_v22 }
 0x41f   :  { %v879_v27 = vmul.f32 %v877_v24, %v873_v23 }
 0x420   :  { %v878_v28 = vmul.f32 %v876_v26, %v872_v25 }
 0x427   :  { %v1437_v29 = vpop.eup %1436 }
 0x428   :  { %v1439_v30 = vpop.eup %1438  ;;  %v893_v31 = vmul.f32 %v1437_v29, %v879_v27 }
 0x429   :  { %v891_v32 = vmul.f32 %v1439_v30, %v878_v28 }
 0x42b   :  { %v894_v33 = vadd.f32 %v893_v31, %v891_v32 }
 0x42d   :  { %v895_v34 = vrot.slane %v894_v33, 4 }
 0x42f   :  { %v896_v35 = vadd.f32 %v895_v34, %v894_v33 }
 0x431   :  { %v897_v36 = vrot.slane %v896_v35, 2 }
 0x433   :  { %v898_v37 = vadd.f32 %v897_v36, %v896_v35 }
 0x435   :  { %v899_v38 = vrot.slane %v898_v37, 1 }
 0x437   :  { %v900_v39 = vadd.f32 %v899_v38, %v898_v37 }
 0x439   :  { %901 = vst [vmem:[#allocation10] sm:$0x1] %v900_v39 }
 0x43a   :  { %1539 = shalt.err (!%p1536_p8)
}
 0x43b   :  { %s1540_s14 = scalar_lea.hbm %s1812_s4, 16 }
 0x43c   :  { %p1541_p9 = scmp.ne.s32.totalorder %s1812_s4, %s1540_s14  ;;  %p1544_p10 = scmp.lt.u32.totalorder %s1540_s14, %s1812_s4 }
 0x43e   :  { %p1546_p11 = pnand %p1544_p10, %p1541_p9 }
 0x440   :  { %1549 = shalt.err (!%p1546_p11)
}
 0x441   :  { %911 = dma.vmem_to_hbm [thread:$0]  %s909_s27, 16, %s1812_s4, [#allocation4]  }
 0x442   :  { %1556 = dma.done.wait [#allocation4], 16  }
 0x443   :  { %1557 = vsyncadd [#allocation4], 4294967280 }
 0x444   :  { %915 = vsyncpa [#allocation3], 1 }
 0x445   :  { %916 = vsyncpa [#allocation6], 1 }
 0x446   :  { %917 = vsyncpa [#allocation9], 1 }
 0x447   :  { %918 = vsyncpa [#allocation4], 1 }

</bundles_post_ra>
